<compile_context>
chip_gen: v6e
topology: v6e:2x2x1
jax: 0.10.0
libtpu: 0.0.40
codegen_flags: <defaults>
</compile_context>

<pallas_src>
import functools

import jax
import jax.numpy as jnp
from jax.experimental import pallas as pl
from jax.experimental.pallas import tpu as pltpu

# Module-level hyperparameters referenced by the PyTorch module as globals.
MLP_LAYERS = 3     # => MLP_LAYERS - 2 = 1 "mid" hidden layer in self.linears
DROPOUT = 0.1      # identity at inference time

_LANE = 128        # TPU lane width (last-dim alignment)
_SUBLANE_F32 = 8   # f32 sublane alignment
_SUBLANE_BF16 = 16 # bf16 sublane packing (2 rows per 32-bit sublane)


def _round_up(x, m):
    return (x + m - 1) // m * m


def _pad_to(a, shape):
    pads = [(0, t - s) for s, t in zip(a.shape, shape)]
    if all(p == (0, 0) for p in pads):
        return a
    return jnp.pad(a, pads)


def _vmem_cap_bytes():
    """Generation-aware VMEM budget (leave headroom for compiler scratch)."""
    try:
        phys = int(pltpu.get_tpu_info().vmem_capacity_bytes)
    except Exception:
        phys = 64 << 20                       # conservative (v7x-sized) default
    if phys >= (128 << 20):
        return 100 << 20                      # v5e / v6e: 128 MiB parts
    return max(phys - (16 << 20), 32 << 20)   # v7x: ~48 MiB of 64 MiB


def _choose_tile_b(batch, sublane):
    """Pick a sublane-aligned batch tile.

    * medium batches: >=2 grid steps so both v7x TensorCores get work
    * large batches: 256-row tiles fill the 256-wide v6e/v7x MXU
    * shrink the tile if the last tile would waste >~25% in padding
    """
    b_al = _round_up(batch, sublane)
    if b_al <= 2 * sublane:
        return b_al
    if b_al <= 512:
        return _round_up(pl.cdiv(b_al, 2), sublane)
    tile = 256
    rem = b_al % tile
    if rem and (tile - rem) > tile // 4:
        n_tiles = pl.cdiv(b_al, tile)
        tile = _round_up(pl.cdiv(b_al, n_tiles), sublane)
    return tile


# ----------------------------------------------------------------------------
# Kernel
# ----------------------------------------------------------------------------
def _mlp_kernel(x_ref, w_in_ref, b_in_ref, w_mid_ref, b_mid_ref, w_out_ref,
                o_ref, *scratch, n_mid, stream_mid):
    """Fused MLP forward for one (tile_b, *) batch tile.

    x_ref:     (tile_b, d_in_p)    bf16 (MXU dtype)
    w_in_ref:  (d_in_p, h_p)       bf16
    b_in_ref:  (1, h_p)            f32  (biases kept f32 end-to-end)
    w_mid_ref: (n_mid, h_p, h_p)   bf16 VMEM  -- or HBM ref when stream_mid
    b_mid_ref: (n_mid, 1, h_p)     f32  VMEM  -- or HBM ref when stream_mid
    w_out_ref: (h_p, d_out_p)      bf16
    o_ref:     (tile_b, d_out_p)   f32 (or bf16 if requested)
    scratch (only when stream_mid): w_buf (2,h_p,h_p) bf16, b_buf (2,1,h_p) f32,
                                    sem DMA (2,2)
    """
    mxu_dtype = w_in_ref.dtype

    if stream_mid:
        w_buf, b_buf, sem = scratch

        def fetch(layer, slot):
            pltpu.make_async_copy(w_mid_ref.at[layer], w_buf.at[slot],
                                  sem.at[0, slot]).start()
            pltpu.make_async_copy(b_mid_ref.at[layer], b_buf.at[slot],
                                  sem.at[1, slot]).start()

        # Overlap the layer-0 weight DMA with the input-layer matmul.
        fetch(0, 0)

    # First layer: Linear(input -> hidden) + bias.  Dropout = identity.
    h = jnp.dot(x_ref[...], w_in_ref[...], preferred_element_type=jnp.float32)
    h = h + b_in_ref[...]                        # f32 bias add on the VPU

    # Mid layers: Linear(hidden -> hidden) + bias.  No ReLU (matches forward()).
    for l in range(n_mid):                       # small static unroll
        if stream_mid:
            slot = l & 1
            pltpu.make_async_copy(w_mid_ref.at[l], w_buf.at[slot],
                                  sem.at[0, slot]).wait()
            pltpu.make_async_copy(b_mid_ref.at[l], b_buf.at[slot],
                                  sem.at[1, slot]).wait()
            if l + 1 < n_mid:
                fetch(l + 1, 1 - slot)           # prefetch next layer's weights
            w_l = w_buf[slot]
            b_l = b_buf[slot]
        else:
            w_l = w_mid_ref[l]
            b_l = b_mid_ref[l]
        h = jnp.dot(h.astype(mxu_dtype), w_l, preferred_element_type=jnp.float32)
        h = h + b_l

    # Logits layer (no bias) + tanh; tanh in f32 on the EUP.
    out = jnp.dot(h.astype(mxu_dtype), w_out_ref[...],
                  preferred_element_type=jnp.float32)
    o_ref[...] = jnp.tanh(out).astype(o_ref.dtype)


# ----------------------------------------------------------------------------
# Wrapper
# ----------------------------------------------------------------------------
def prepare_params(params, *, weights_dtype=jnp.bfloat16):
    """Pad / cast the weights ONCE at model-load time (hoisted out of forward).

    params: dict with
        'w_in'  (input_size, hidden), 'b_in' (hidden,)
        'w_mid' (n_mid, hidden, hidden), 'b_mid' (n_mid, hidden)
        'w_out' (hidden, output_size)        # logits: no bias
    """
    input_size, hidden = params["w_in"].shape
    output_size = params["w_out"].shape[1]
    n_mid = params["w_mid"].shape[0]
    # TODO(synk): MLP_Layers == 1 / == 2 configurations (no mid layers) are not
    # covered by this fused kernel; it assumes at least one mid layer.
    assert n_mid >= 1, "kernel covers MLP_Layers >= 3 (at least one mid layer)"

    d_in_p = _round_up(input_size, _LANE)
    h_p = _round_up(hidden, _LANE)
    d_out_p = _round_up(output_size, _LANE)

    prepared = dict(
        w_in=_pad_to(params["w_in"], (d_in_p, h_p)).astype(weights_dtype),
        b_in=_pad_to(params["b_in"].reshape(1, hidden),
                     (1, h_p)).astype(jnp.float32),
        w_mid=_pad_to(params["w_mid"], (n_mid, h_p, h_p)).astype(weights_dtype),
        b_mid=_pad_to(params["b_mid"].reshape(n_mid, 1, hidden),
                      (n_mid, 1, h_p)).astype(jnp.float32),
        w_out=_pad_to(params["w_out"], (h_p, d_out_p)).astype(weights_dtype),
    )
    dims = dict(input_size=input_size, hidden=hidden, output_size=output_size,
                n_mid=n_mid, d_in_p=d_in_p, h_p=h_p, d_out_p=d_out_p,
                weights_dtype=weights_dtype)
    return prepared, dims


def mlp_forward(x, prepared, dims, *, tile_b=None, stream_mid_weights=None,
                out_dtype=jnp.float32):
    """Run the fused Pallas MLP kernel.  x: (B, input_size) float32."""
    B, input_size = x.shape
    assert input_size == dims["input_size"]
    n_mid = dims["n_mid"]
    d_in_p, h_p, d_out_p = dims["d_in_p"], dims["h_p"], dims["d_out_p"]
    output_size = dims["output_size"]
    weights_dtype = dims["weights_dtype"]

    act_dtype = weights_dtype       # ship x in MXU dtype (halves input DMA)
    act_isize = jnp.dtype(act_dtype).itemsize
    out_isize = jnp.dtype(out_dtype).itemsize
    sublane = _SUBLANE_BF16 if act_isize == 2 else _SUBLANE_F32

    # ---- batch tiling: real "parallel" grid, sublane-aligned tiles ----------
    if tile_b is None:
        tile_b = _choose_tile_b(B, sublane)
    tile_b = _round_up(tile_b, sublane)
    b_p = _round_up(B, tile_b)
    grid = (b_p // tile_b,)

    x_p = _pad_to(x.astype(act_dtype), (b_p, d_in_p))

    # ---- weight footprints, VMEM budget, streaming decision -----------------
    mid_w_bytes = (int(prepared["w_mid"].size) * prepared["w_mid"].dtype.itemsize
                   + int(prepared["b_mid"].size) * prepared["b_mid"].dtype.itemsize)
    other_w_bytes = sum(int(prepared[k].size) * prepared[k].dtype.itemsize
                        for k in ("w_in", "b_in", "w_out"))
    vmem_cap = _vmem_cap_bytes()

    if stream_mid_weights is None:
        # Stream when the resident mid-weight stack would crowd VMEM, or when a
        # single-step grid gives zero overlap between weight DMA and compute.
        stream_mid_weights = (mid_w_bytes > vmem_cap // 4) or \
                             (grid[0] == 1 and mid_w_bytes > (4 << 20))

    act_bytes = 2 * tile_b * d_in_p * act_isize + 2 * tile_b * d_out_p * out_isize
    if stream_mid_weights:
        w_isize = jnp.dtype(weights_dtype).itemsize
        resident_w = other_w_bytes + 2 * (h_p * h_p * w_isize + h_p * 4)
        scratch_shapes = [
            pltpu.VMEM((2, h_p, h_p), weights_dtype),   # double-buffered W_mid
            pltpu.VMEM((2, 1, h_p), jnp.float32),       # double-buffered b_mid
            pltpu.SemaphoreType.DMA((2, 2)),
        ]
    else:
        resident_w = other_w_bytes + mid_w_bytes        # single-buffered params
        scratch_shapes = []
    vmem_need = act_bytes + resident_w + (2 << 20)      # slack
    vmem_limit = int(min(max(vmem_need, 16 << 20), vmem_cap))

    # ---- cost estimate -------------------------------------------------------
    flops = 2 * b_p * (d_in_p * h_p + n_mid * h_p * h_p + h_p * d_out_p)
    w_reads = other_w_bytes + (grid[0] if stream_mid_weights else 1) * mid_w_bytes
    bytes_accessed = int(x_p.size) * act_isize + w_reads + b_p * d_out_p * out_isize
    cost = pl.CostEstimate(flops=int(flops),
                           transcendentals=int(b_p * d_out_p),
                           bytes_accessed=int(bytes_accessed))

    kernel = functools.partial(_mlp_kernel, n_mid=n_mid,
                               stream_mid=stream_mid_weights)

    def run(param_mode):
        def pspec(shape, index_map):
            if param_mode is None:
                return pl.BlockSpec(shape, index_map)
            return pl.BlockSpec(shape, index_map, pipeline_mode=param_mode)

        in_specs = [
            # batch-tiled activation input
            pl.BlockSpec((tile_b, d_in_p), lambda i: (i, 0)),
            # parameters: constant index_map -> fetched once; single-buffered.
            pspec((d_in_p, h_p), lambda i: (0, 0)),
            pspec((1, h_p), lambda i: (0, 0)),
        ]
        if stream_mid_weights:
            # raw HBM refs, manually double-buffered inside the kernel
            in_specs += [pl.BlockSpec(memory_space=pl.ANY),
                         pl.BlockSpec(memory_space=pl.ANY)]
        else:
            in_specs += [pspec((n_mid, h_p, h_p), lambda i: (0, 0, 0)),
                         pspec((n_mid, 1, h_p), lambda i: (0, 0, 0))]
        in_specs.append(pspec((h_p, d_out_p), lambda i: (0, 0)))

        return pl.pallas_call(
            kernel,
            out_shape=jax.ShapeDtypeStruct((b_p, d_out_p), out_dtype),
            grid_spec=pltpu.PrefetchScalarGridSpec(
                num_scalar_prefetch=0,
                grid=grid,
                in_specs=in_specs,
                out_specs=pl.BlockSpec((tile_b, d_out_p), lambda i: (i, 0)),
                scratch_shapes=scratch_shapes),
            compiler_params=pltpu.CompilerParams(
                dimension_semantics=("parallel",),
                vmem_limit_bytes=vmem_limit),
            cost_estimate=cost,
        )(x_p, prepared["w_in"], prepared["b_in"], prepared["w_mid"],
          prepared["b_mid"], prepared["w_out"])

    try:
        # Single-buffer the constant parameter blocks (saves ~weight_bytes of VMEM).
        out_p = run(pl.Buffered(1))
    except Exception:
        # Fallback for jax builds that reject pipeline_mode=Buffered(1).
        out_p = run(None)

    # Slice the batch / lane padding back off.
    return out_p[:B, :output_size]


# ----------------------------------------------------------------------------
# Reference & init
# ----------------------------------------------------------------------------
def init_params(key, input_size, hidden_size, output_size, n_mid):
    """Deterministic parameter init (PyTorch-Linear-style uniform bounds)."""
    ks = jax.random.split(key, 5)

    def uni(k, shape, fan_in):
        bound = 1.0 / jnp.sqrt(float(fan_in))
        return jax.random.uniform(k, shape, jnp.float32, -bound, bound)

    # Stored already transposed to (in, out) for the kernel.
    w_in = uni(ks[0], (input_size, hidden_size), input_size)
    b_in = uni(ks[1], (hidden_size,), input_size)
    w_mid = uni(ks[2], (n_mid, hidden_size, hidden_size), hidden_size)
    b_mid = uni(ks[3], (n_mid, hidden_size), hidden_size)
    w_out = uni(ks[4], (hidden_size, output_size), hidden_size)  # logits: no bias
    return dict(w_in=w_in, b_in=b_in, w_mid=w_mid, b_mid=b_mid, w_out=w_out)


def mlp_reference(x, params, *, matmul_dtype=jnp.float32):
    """Pure-JAX reference of the same forward.

    matmul_dtype=jnp.bfloat16 mimics the kernel's bf16 MXU inputs with f32
    accumulation and f32 biases, for a tight correctness comparison.
    """
    def cast(a):
        return a.astype(matmul_dtype)

    h = jnp.dot(cast(x), cast(params["w_in"]), preferred_element_type=jnp.float32)
    h = h + params["b_in"].astype(jnp.float32)
    for l in range(params["w_mid"].shape[0]):
        h = jnp.dot(cast(h), cast(params["w_mid"][l]),
                    preferred_element_type=jnp.float32)
        h = h + params["b_mid"][l].astype(jnp.float32)
    out = jnp.dot(cast(h), cast(params["w_out"]),
                  preferred_element_type=jnp.float32)
    return jnp.tanh(out)


if __name__ == "__main__":
    # Small shapes consistent with the module's forward: x is (batch, input_size).
    # NOTE: at these toy sizes the kernel is pure fixed overhead; benchmark on
    # realistic (B, hidden) with min-of-N xprof timings before drawing conclusions.
    batch = 32
    input_size = 32
    hidden_size = 32
    output_size = 16
    n_mid = MLP_LAYERS - 2  # 1

    key = jax.random.PRNGKey(0)
    kx, kp = jax.random.split(key)
    x = jax.random.normal(kx, (batch, input_size), dtype=jnp.float32)
    params = init_params(kp, input_size, hidden_size, output_size, n_mid)

    # Weight padding / bf16 cast hoisted out of the per-call path.
    prepared, dims = prepare_params(params)

    # Resident-weights path; tile_b=16 -> 2-step "parallel" grid even at this
    # tiny batch (exercises pipelining / both v7x TensorCores).
    out = mlp_forward(x, prepared, dims, tile_b=16)
    out = jax.block_until_ready(out)
    assert out.shape == (batch, output_size)

    # Streamed mid-layer-weights path (manual double-buffered DMA) — same math.
    out_s = mlp_forward(x, prepared, dims, tile_b=16, stream_mid_weights=True)
    out_s = jax.block_until_ready(out_s)
    assert out_s.shape == (batch, output_size)

    # Tight check vs. a reference that mimics the kernel's bf16 MXU inputs.
    ref_bf16 = mlp_reference(x, params, matmul_dtype=jnp.bfloat16)
    assert jnp.allclose(out, ref_bf16, atol=1e-4, rtol=1e-4), (
        float(jnp.max(jnp.abs(out - ref_bf16))))
    assert jnp.allclose(out_s, ref_bf16, atol=1e-4, rtol=1e-4), (
        float(jnp.max(jnp.abs(out_s - ref_bf16))))

    # Loose check vs. the exact f32 reference (bf16 weights relax tolerance).
    ref_f32 = mlp_reference(x, params, matmul_dtype=jnp.float32)
    assert jnp.allclose(out, ref_f32, atol=5e-2, rtol=5e-2), (
        float(jnp.max(jnp.abs(out - ref_f32))))

    print("KERNEL_OK")
</pallas_src>

<mosaic_0001>
module attributes {stable_mosaic.version = 11 : i64} {
  func.func @_mlp_kernel(%arg0: i32, %arg1: memref<16x128xbf16, #tpu.memory_space<vmem>>, %arg2: memref<128x128xbf16, #tpu.memory_space<vmem>>, %arg3: memref<1x128xf32, #tpu.memory_space<vmem>>, %arg4: memref<1x128x128xbf16, #tpu.memory_space<vmem>>, %arg5: memref<1x1x128xf32, #tpu.memory_space<vmem>>, %arg6: memref<128x128xbf16, #tpu.memory_space<vmem>>, %arg7: memref<16x128xf32, #tpu.memory_space<vmem>>) attributes {dimension_semantics = [#tpu.dimension_semantics<parallel>], iteration_bounds = array<i64: 2>, scalar_prefetch = 0 : i64, scratch_operands = 0 : i64, tpu.core_type = #tpu.core_type<tc>, window_params = [{transform_indices = @transform_0, window_bounds = array<i64: 16, 128>}, {pipeline_mode = #tpu.pipeline_mode<synchronous>, transform_indices = @transform_1, window_bounds = array<i64: 128, 128>}, {pipeline_mode = #tpu.pipeline_mode<synchronous>, transform_indices = @transform_2, window_bounds = array<i64: 1, 128>}, {pipeline_mode = #tpu.pipeline_mode<synchronous>, transform_indices = @transform_3, window_bounds = array<i64: 1, 128, 128>}, {pipeline_mode = #tpu.pipeline_mode<synchronous>, transform_indices = @transform_4, window_bounds = array<i64: 1, 1, 128>}, {pipeline_mode = #tpu.pipeline_mode<synchronous>, transform_indices = @transform_5, window_bounds = array<i64: 128, 128>}, {transform_indices = @transform_6, window_bounds = array<i64: 16, 128>}]} {
    %c0 = arith.constant 0 : index
    %c0_0 = arith.constant 0 : index
    %0 = vector.load %arg1[%c0, %c0_0] : memref<16x128xbf16, #tpu.memory_space<vmem>>, vector<16x128xbf16>
    %c0_1 = arith.constant 0 : index
    %c0_2 = arith.constant 0 : index
    %1 = vector.load %arg2[%c0_1, %c0_2] : memref<128x128xbf16, #tpu.memory_space<vmem>>, vector<128x128xbf16>
    %cst = arith.constant dense<0.000000e+00> : vector<16x128xf32>
    %2 = tpu.matmul %0, %1, %cst {dimension_numbers = #tpu.dot_dimension_numbers<[1], [0], [0], [1], [0, 0, 1, 1], [], []>} : vector<16x128xbf16>, vector<128x128xbf16>, vector<16x128xf32> -> vector<16x128xf32>
    %c0_3 = arith.constant 0 : index
    %c0_4 = arith.constant 0 : index
    %3 = vector.load %arg3[%c0_3, %c0_4] : memref<1x128xf32, #tpu.memory_space<vmem>>, vector<1x128xf32>
    %4 = vector.broadcast %3 : vector<1x128xf32> to vector<16x128xf32>
    %5 = arith.addf %2, %4 : vector<16x128xf32>
    %c0_5 = arith.constant 0 : index
    %c0_6 = arith.constant 0 : index
    %c0_7 = arith.constant 0 : index
    %6 = vector.load %arg4[%c0_5, %c0_6, %c0_7] : memref<1x128x128xbf16, #tpu.memory_space<vmem>>, vector<1x128x128xbf16>
    %7 = vector.shape_cast %6 : vector<1x128x128xbf16> to vector<128x128xbf16>
    %c0_8 = arith.constant 0 : index
    %c0_9 = arith.constant 0 : index
    %c0_10 = arith.constant 0 : index
    %8 = vector.load %arg5[%c0_8, %c0_9, %c0_10] : memref<1x1x128xf32, #tpu.memory_space<vmem>>, vector<1x1x128xf32>
    %9 = vector.shape_cast %8 : vector<1x1x128xf32> to vector<1x128xf32>
    %10 = arith.truncf %5 : vector<16x128xf32> to vector<16x128xbf16>
    %cst_11 = arith.constant dense<0.000000e+00> : vector<16x128xf32>
    %11 = tpu.matmul %10, %7, %cst_11 {dimension_numbers = #tpu.dot_dimension_numbers<[1], [0], [0], [1], [0, 0, 1, 1], [], []>} : vector<16x128xbf16>, vector<128x128xbf16>, vector<16x128xf32> -> vector<16x128xf32>
    %12 = vector.broadcast %9 : vector<1x128xf32> to vector<16x128xf32>
    %13 = arith.addf %11, %12 : vector<16x128xf32>
    %14 = arith.truncf %13 : vector<16x128xf32> to vector<16x128xbf16>
    %c0_12 = arith.constant 0 : index
    %c0_13 = arith.constant 0 : index
    %15 = vector.load %arg6[%c0_12, %c0_13] : memref<128x128xbf16, #tpu.memory_space<vmem>>, vector<128x128xbf16>
    %cst_14 = arith.constant dense<0.000000e+00> : vector<16x128xf32>
    %16 = tpu.matmul %14, %15, %cst_14 {dimension_numbers = #tpu.dot_dimension_numbers<[1], [0], [0], [1], [0, 0, 1, 1], [], []>} : vector<16x128xbf16>, vector<128x128xbf16>, vector<16x128xf32> -> vector<16x128xf32>
    %17 = math.tanh %16 : vector<16x128xf32>
    %c0_15 = arith.constant 0 : index
    %c0_16 = arith.constant 0 : index
    %18 = vector.load %arg7[%c0_15, %c0_16] : memref<16x128xf32, #tpu.memory_space<vmem>>, vector<16x128xf32>
    tpu.vector_store %arg7[%c0_15, %c0_16], %17 {strides = array<i32>} : memref<16x128xf32, #tpu.memory_space<vmem>>, vector<16x128xf32>,
    return
  }
  func.func @transform_0(%arg0: i32) -> (i32, i32) {
    %c0_i32 = arith.constant 0 : i32
    %c0_i32_0 = arith.constant 0 : i32
    return %arg0, %c0_i32 : i32, i32
  }
  func.func @transform_1(%arg0: i32) -> (i32, i32) {
    %c0_i32 = arith.constant 0 : i32
    %c0_i32_0 = arith.constant 0 : i32
    %c0_i32_1 = arith.constant 0 : i32
    return %c0_i32, %c0_i32_0 : i32, i32
  }
  func.func @transform_2(%arg0: i32) -> (i32, i32) {
    %c0_i32 = arith.constant 0 : i32
    %c0_i32_0 = arith.constant 0 : i32
    %c0_i32_1 = arith.constant 0 : i32
    return %c0_i32, %c0_i32_0 : i32, i32
  }
  func.func @transform_3(%arg0: i32) -> (i32, i32, i32) {
    %c0_i32 = arith.constant 0 : i32
    %c0_i32_0 = arith.constant 0 : i32
    %c0_i32_1 = arith.constant 0 : i32
    %c0_i32_2 = arith.constant 0 : i32
    return %c0_i32, %c0_i32_0, %c0_i32_1 : i32, i32, i32
  }
  func.func @transform_4(%arg0: i32) -> (i32, i32, i32) {
    %c0_i32 = arith.constant 0 : i32
    %c0_i32_0 = arith.constant 0 : i32
    %c0_i32_1 = arith.constant 0 : i32
    %c0_i32_2 = arith.constant 0 : i32
    return %c0_i32, %c0_i32_0, %c0_i32_1 : i32, i32, i32
  }
  func.func @transform_5(%arg0: i32) -> (i32, i32) {
    %c0_i32 = arith.constant 0 : i32
    %c0_i32_0 = arith.constant 0 : i32
    %c0_i32_1 = arith.constant 0 : i32
    return %c0_i32, %c0_i32_0 : i32, i32
  }
  func.func @transform_6(%arg0: i32) -> (i32, i32) {
    %c0_i32 = arith.constant 0 : i32
    %c0_i32_0 = arith.constant 0 : i32
    return %arg0, %c0_i32 : i32, i32
  }
}

module attributes {stable_mosaic.version = 11 : i64} {
  func.func @_mlp_kernel(%arg0: i32, %arg1: memref<16x128xbf16, #tpu.memory_space<vmem>>, %arg2: memref<128x128xbf16, #tpu.memory_space<vmem>>, %arg3: memref<1x128xf32, #tpu.memory_space<vmem>>, %arg4: memref<1x128x128xbf16, #tpu.memory_space<vmem>>, %arg5: memref<1x1x128xf32, #tpu.memory_space<vmem>>, %arg6: memref<128x128xbf16, #tpu.memory_space<vmem>>, %arg7: memref<16x128xf32, #tpu.memory_space<vmem>>) attributes {dimension_semantics = [#tpu.dimension_semantics<parallel>], iteration_bounds = array<i64: 2>, scalar_prefetch = 0 : i64, scratch_operands = 0 : i64, tpu.core_type = #tpu.core_type<tc>, window_params = [{transform_indices = @transform_0, window_bounds = array<i64: 16, 128>}, {pipeline_mode = #tpu.pipeline_mode<synchronous>, transform_indices = @transform_1, window_bounds = array<i64: 128, 128>}, {pipeline_mode = #tpu.pipeline_mode<synchronous>, transform_indices = @transform_2, window_bounds = array<i64: 1, 128>}, {pipeline_mode = #tpu.pipeline_mode<synchronous>, transform_indices = @transform_3, window_bounds = array<i64: 1, 128, 128>}, {pipeline_mode = #tpu.pipeline_mode<synchronous>, transform_indices = @transform_4, window_bounds = array<i64: 1, 1, 128>}, {pipeline_mode = #tpu.pipeline_mode<synchronous>, transform_indices = @transform_5, window_bounds = array<i64: 128, 128>}, {transform_indices = @transform_6, window_bounds = array<i64: 16, 128>}]} {
    %c0 = arith.constant 0 : index
    %c0_0 = arith.constant 0 : index
    %0 = vector.load %arg1[%c0, %c0_0] : memref<16x128xbf16, #tpu.memory_space<vmem>>, vector<16x128xbf16>
    %c0_1 = arith.constant 0 : index
    %c0_2 = arith.constant 0 : index
    %1 = vector.load %arg2[%c0_1, %c0_2] : memref<128x128xbf16, #tpu.memory_space<vmem>>, vector<128x128xbf16>
    %cst = arith.constant dense<0.000000e+00> : vector<16x128xf32>
    %2 = tpu.matmul %0, %1, %cst {dimension_numbers = #tpu.dot_dimension_numbers<[1], [0], [0], [1], [0, 0, 1, 1], [], []>} : vector<16x128xbf16>, vector<128x128xbf16>, vector<16x128xf32> -> vector<16x128xf32>
    %c0_3 = arith.constant 0 : index
    %c0_4 = arith.constant 0 : index
    %3 = vector.load %arg3[%c0_3, %c0_4] : memref<1x128xf32, #tpu.memory_space<vmem>>, vector<1x128xf32>
    %4 = vector.broadcast %3 : vector<1x128xf32> to vector<16x128xf32>
    %5 = arith.addf %2, %4 : vector<16x128xf32>
    %c0_5 = arith.constant 0 : index
    %c0_6 = arith.constant 0 : index
    %c0_7 = arith.constant 0 : index
    %6 = vector.load %arg4[%c0_5, %c0_6, %c0_7] : memref<1x128x128xbf16, #tpu.memory_space<vmem>>, vector<1x128x128xbf16>
    %7 = vector.shape_cast %6 : vector<1x128x128xbf16> to vector<128x128xbf16>
    %c0_8 = arith.constant 0 : index
    %c0_9 = arith.constant 0 : index
    %c0_10 = arith.constant 0 : index
    %8 = vector.load %arg5[%c0_8, %c0_9, %c0_10] : memref<1x1x128xf32, #tpu.memory_space<vmem>>, vector<1x1x128xf32>
    %9 = vector.shape_cast %8 : vector<1x1x128xf32> to vector<1x128xf32>
    %10 = arith.truncf %5 : vector<16x128xf32> to vector<16x128xbf16>
    %cst_11 = arith.constant dense<0.000000e+00> : vector<16x128xf32>
    %11 = tpu.matmul %10, %7, %cst_11 {dimension_numbers = #tpu.dot_dimension_numbers<[1], [0], [0], [1], [0, 0, 1, 1], [], []>} : vector<16x128xbf16>, vector<128x128xbf16>, vector<16x128xf32> -> vector<16x128xf32>
    %12 = vector.broadcast %9 : vector<1x128xf32> to vector<16x128xf32>
    %13 = arith.addf %11, %12 : vector<16x128xf32>
    %14 = arith.truncf %13 : vector<16x128xf32> to vector<16x128xbf16>
    %c0_12 = arith.constant 0 : index
    %c0_13 = arith.constant 0 : index
    %15 = vector.load %arg6[%c0_12, %c0_13] : memref<128x128xbf16, #tpu.memory_space<vmem>>, vector<128x128xbf16>
    %cst_14 = arith.constant dense<0.000000e+00> : vector<16x128xf32>
    %16 = tpu.matmul %14, %15, %cst_14 {dimension_numbers = #tpu.dot_dimension_numbers<[1], [0], [0], [1], [0, 0, 1, 1], [], []>} : vector<16x128xbf16>, vector<128x128xbf16>, vector<16x128xf32> -> vector<16x128xf32>
    %17 = math.tanh %16 : vector<16x128xf32>
    %c0_15 = arith.constant 0 : index
    %c0_16 = arith.constant 0 : index
    %18 = vector.load %arg7[%c0_15, %c0_16] : memref<16x128xf32, #tpu.memory_space<vmem>>, vector<16x128xf32>
    tpu.vector_store %arg7[%c0_15, %c0_16], %17 {strides = array<i32>} : memref<16x128xf32, #tpu.memory_space<vmem>>, vector<16x128xf32>,
    return
  }
  func.func @transform_0(%arg0: i32) -> (i32, i32) {
    %c0_i32 = arith.constant 0 : i32
    %c0_i32_0 = arith.constant 0 : i32
    return %arg0, %c0_i32 : i32, i32
  }
  func.func @transform_1(%arg0: i32) -> (i32, i32) {
    %c0_i32 = arith.constant 0 : i32
    %c0_i32_0 = arith.constant 0 : i32
    %c0_i32_1 = arith.constant 0 : i32
    return %c0_i32, %c0_i32_0 : i32, i32
  }
  func.func @transform_2(%arg0: i32) -> (i32, i32) {
    %c0_i32 = arith.constant 0 : i32
    %c0_i32_0 = arith.constant 0 : i32
    %c0_i32_1 = arith.constant 0 : i32
    return %c0_i32, %c0_i32_0 : i32, i32
  }
  func.func @transform_3(%arg0: i32) -> (i32, i32, i32) {
    %c0_i32 = arith.constant 0 : i32
    %c0_i32_0 = arith.constant 0 : i32
    %c0_i32_1 = arith.constant 0 : i32
    %c0_i32_2 = arith.constant 0 : i32
    return %c0_i32, %c0_i32_0, %c0_i32_1 : i32, i32, i32
  }
  func.func @transform_4(%arg0: i32) -> (i32, i32, i32) {
    %c0_i32 = arith.constant 0 : i32
    %c0_i32_0 = arith.constant 0 : i32
    %c0_i32_1 = arith.constant 0 : i32
    %c0_i32_2 = arith.constant 0 : i32
    return %c0_i32, %c0_i32_0, %c0_i32_1 : i32, i32, i32
  }
  func.func @transform_5(%arg0: i32) -> (i32, i32) {
    %c0_i32 = arith.constant 0 : i32
    %c0_i32_0 = arith.constant 0 : i32
    %c0_i32_1 = arith.constant 0 : i32
    return %c0_i32, %c0_i32_0 : i32, i32
  }
  func.func @transform_6(%arg0: i32) -> (i32, i32) {
    %c0_i32 = arith.constant 0 : i32
    %c0_i32_0 = arith.constant 0 : i32
    return %arg0, %c0_i32 : i32, i32
  }
}

</mosaic_0001>

<bundles_post_ra>
// kernel: tpu_custom_call.1
= control target key start
LH: loop header
LB: loop body
LE: loop exit
PB: predicated region body
PF: predicated region fallthrough
CT: control target
= control target key end

     0   :  { %11 = vsyncpa [#allocation3], 0  ;;  %s1502_s0 = inlined_call_operand.hbm [shape: bf16[32,128], index: 0, kind: input, shape index: {}]   ;;  %s1503_s1 = inlined_call_operand.hbm [shape: bf16[128,128], index: 1, kind: input, shape index: {}]   ;;  %s1504_s2 = inlined_call_operand.vmem [shape: f32[1,128], index: 2, kind: input, shape index: {}]   ;;  %s1505_s3 = inlined_call_operand.hbm [shape: bf16[1,128,128], index: 3, kind: input, shape index: {}]   ;;  %s1506_s4 = inlined_call_operand.vmem [shape: f32[1,1,128], index: 4, kind: input, shape index: {}]   ;;  %s1507_s5 = inlined_call_operand.hbm [shape: bf16[128,128], index: 5, kind: input, shape index: {}]   ;;  %s1508_s6 = inlined_call_operand.hbm [shape: f32[32,128], index: 6, kind: output, shape index: {}]  }
   0x1   :  { %13 = vsyncpa [#allocation3 + $0x1], 0 }
   0x2   :  { %14 = vsyncpa [#allocation6], 0 }
   0x3   :  { %15 = vsyncpa [#allocation9], 0 }
   0x4   :  { %16 = vsyncpa [#allocation4], 0 }
   0x5   :  { %18 = vsyncpa [#allocation4 + $0x1], 0  ;;  %s1250_s21 = smov 0   ;;  %s1252_s22 = smov 0  }
   0x6   :  { %s1254_s23 = smov 0   ;;  %s1256_s24 = smov 0  }
   0x7 LB: > { %s1271_s25 = sadd.s32 4294967295, %s1202_s24   ;;  %s776_s26 = sadd.s32 4294967294, %s1202_s24   ;;  %s1202_s24 = sphi %s1256_s24, %s1535_s24   ;;  %s1198_s23 = sphi %s1254_s23, %s1534_s23   ;;  %s1194_s22 = sphi %s1252_s22, %s1533_s22   ;;  %s1190_s21 = sphi %s1250_s21, %s1532_s21  }
   0x8   : > { %p44_p0 = scmp.ne.s32.totalorder %s1194_s22, %s1190_s21  ;;  %p1509_p1 = scmp.eq.s32.totalorder %s1271_s25, 0 }
   0x9   : > { %p173_p2 = scmp.eq.s32.totalorder %s1271_s25, 1  ;;  %p179_p3 = scmp.eq.s32.totalorder %s776_s26, 1 }
   0xa   : > { %p1280_p4 = por %p1509_p1, %p44_p0  ;;  %p777_p5 = scmp.ge.s32.totalorder %s1202_s24, 1 }
   0xb   : > { %p1285_p6 = por %p179_p3, %p44_p0  ;;  %p186_p7 = scmp.lt.s32.totalorder %s1202_s24, 3 }
   0xc   : > { %s1515_s27 = scalar_select %p1280_p4, 1, 0 }
   0xd   : > { %s1516_s28 = scalar_select %p1285_p6, 1, 0 }
   0xe   : > { %p1290_p8 = pnand %p777_p5, %p186_p7  ;;  %s1204_s30 = smov [#allocation5]  }
   0xf   : > { %s198_s7 = sshll.u32 %s1204_s30, 4  ;;  %s1205_s9 = smov [#allocation7]   ;;  %s199_s7 = int_to_ptr.vmem [resolvable:$true] %s198_s7 }
  0x10   : > { %s1517_s29 = scalar_select %p1290_p8, 1, 0 }
  0x11   : > { %p928_p9 = pneg %p1290_p8  ;;  %s214_s10 = sshll.u32 %s1205_s9, 4  ;;  %s215_s10 = int_to_ptr.vmem [resolvable:$true] %s214_s10 }
  0x12   : > { %s1206_s11 = smov [#allocation8]   ;;  %s1035_s13 = scalar_lea.vmem %s199_s7, 1024 }
  0x13   : > { %p1299_p11 = pnand %p928_p9, %p1509_p1  ;;  %s230_s12 = sshll.u32 %s1206_s11, 4  ;;  %s231_s12 = int_to_ptr.vmem [resolvable:$true] %s230_s12 }
  0x14   : > { %p1036_p13 = scmp.ne.s32.totalorder %s199_s7, %s1035_s13  ;;  %p1043_p5 = scmp.lt.s32.totalorder %s199_s7, %s199_s7 }
  0x15   : > { %p1026_p12 = pneg %p1299_p11  ;;  %p1044_p7 = scmp.lt.s32.totalorder %s1035_s13, %s1035_s13 }
  0x17   : > { %p1038_p0 = pnand %p1036_p13, %p1026_p12  ;;  %p1045_p9 = por %p1044_p7, %p1043_p5 }
  0x19   : > { %p1039_p3 = pneg %p1038_p0 }
  0x1b   : > { %p1046_p10 = pnand %p1045_p9, %p1039_p3 }
  0x1d   : > { %1049 = shalt.err (!%p1046_p10)
}
  0x1e   : > { %s1510_s14 = smov 64   ;;  %s1511_s15 = smov 4  }
  0x1f   : > { %931 = dma.hbm_to_vmem [thread:$0]  (!%p1299_p11), %s1503_s1, 1024, %s199_s7, [#allocation6], %s1510_s14, %s1510_s14, %s1511_s15  }
  0x20   : > { %s1061_s18 = scalar_lea.vmem %s215_s10, 1024  ;;  %p1069_p3 = scmp.lt.s32.totalorder %s215_s10, %s215_s10 }
  0x21   : > { %p1062_p13 = scmp.ne.s32.totalorder %s215_s10, %s1061_s18  ;;  %p1070_p10 = scmp.lt.s32.totalorder %s1061_s18, %s1061_s18 }
  0x23   : > { %p1064_p0 = pnand %p1062_p13, %p1026_p12  ;;  %p1071_p7 = por %p1070_p10, %p1069_p3 }
  0x25   : > { %p1065_p5 = pneg %p1064_p0 }
  0x27   : > { %p1072_p9 = pnand %p1071_p7, %p1065_p5 }
  0x29   : > { %1075 = shalt.err (!%p1072_p9)
}
  0x2a   : > { %934 = dma.hbm_to_vmem [thread:$0]  (!%p1299_p11), %s1505_s3, 1024, %s215_s10, [#allocation6], %s1510_s14, %s1510_s14, %s1511_s15  }
  0x2b   : > { %s1087_s26 = scalar_lea.vmem %s231_s12, 1024  ;;  %p1095_p3 = scmp.lt.s32.totalorder %s231_s12, %s231_s12 }
  0x2c   : > { %p1088_p1 = scmp.ne.s32.totalorder %s231_s12, %s1087_s26  ;;  %p1096_p5 = scmp.lt.s32.totalorder %s1087_s26, %s1087_s26 }
  0x2e   : > { %p1090_p13 = pnand %p1088_p1, %p1026_p12  ;;  %p1097_p10 = por %p1096_p5, %p1095_p3 }
  0x30   : > { %p1091_p0 = pneg %p1090_p13 }
  0x32   : > { %p1098_p7 = pnand %p1097_p10, %p1091_p0 }
  0x34   : > { %1101 = shalt.err (!%p1098_p7)
}
  0x35   : > { %937 = dma.hbm_to_vmem [thread:$0]  (!%p1299_p11), %s1507_s5, 1024, %s231_s12, [#allocation9], %s1510_s14, %s1510_s14, %s1511_s15  }
  0x36   : > { %s1339_s9 = sadd.s32 1, %s1202_s24   ;;  %s31_s10 = sadd.s32 1, %s1198_s23 }
  0x37   : > { %s28_s8 = ssub.s32 %s1202_s24, %s1339_s9  ;;  %p38_p12 = scmp.ne.s32.totalorder %s1198_s23, %s1194_s22 }
  0x38   : > { %p29_p1 = scmp.eq.s32.totalorder %s28_s8, 0  ;;  %p39_p9 = scmp.eq.s32.totalorder %s1202_s24, 0 }
  0x39   : > { %p949_p13 = scmp.lt.s32.totalorder %s1202_s24, 2  ;;  %p1353_p3 = por %p173_p2, %p38_p12 }
  0x3a   : > { %s1349_s11 = scalar_select %p29_p1, %s1198_s23, %s31_s10  }
  0x3b   : > { %p40_p0 = por %p39_p9, %p38_p12  ;;  %s244_s16 = sand.u32 1, %s1198_s23  }
  0x3c   : > { %s1519_s13 = scalar_select %p1353_p3, 1, 0 }
  0x3d   : > { %s823_s17 = sshll.u32 %s1202_s24, 7  ;;  %s782_s12 = sshll.u32 %s244_s16, 3 }
  0x3e   : > { %s1362_s20 = scalar_lea.hbm %s1502_s0, %s823_s17  ;;  %s248_s26 = scalar_lea.vmem [#allocation2], %s782_s12 }
  0x3f   : > { %s255_s30 = sshll.u32 %s248_s26, 4  ;;  %p1364_p11 = pnand %p949_p13, %p40_p0  ;;  %s1368_s30 = int_to_ptr.vmem [resolvable:$true] %s255_s30 }
  0x40   : > { %s1370_s8 = scalar_lea.sflag [#allocation3], %s244_s16  ;;  %s1102_s10 = scalar_lea.hbm %s1362_s20, 128 }
  0x41   : > { %p1103_p2 = scmp.ne.s32.totalorder %s1362_s20, %s1102_s10  ;;  %p1104_p5 = pneg %p1364_p11 }
  0x42   : > { %s1107_s12 = scalar_lea.hbm %s1502_s0, 256  ;;  %p1108_p1 = scmp.lt.s32.totalorder %s1362_s20, %s1502_s0 }
  0x43   : > { %p1105_p10 = pnand %p1104_p5, %p1103_p2  ;;  %p1109_p12 = scmp.lt.s32.totalorder %s1107_s12, %s1102_s10 }
  0x45   : > { %p1106_p7 = pneg %p1105_p10  ;;  %p1110_p9 = por %p1109_p12, %p1108_p1 }
  0x47   : > { %p1111_p13 = pnand %p1110_p9, %p1106_p7 }
  0x49   : > { %1114 = shalt.err (!%p1111_p13)
}
  0x4a   : > { %s1115_s16 = scalar_lea.vmem %s1368_s30, 128  ;;  %s1209_s14 = smov [#allocation2]  }
  0x4b   : > { %p1116_p0 = scmp.ne.s32.totalorder %s1368_s30, %s1115_s16  ;;  %s1120_s15 = sshll.u32 %s1209_s14, 4  ;;  %s1121_s15 = int_to_ptr.vmem [resolvable:$false] %s1120_s15 }
  0x4c   : > { %s1122_s17 = scalar_lea.vmem %s1121_s15, 256  ;;  %p1123_p10 = scmp.lt.s32.totalorder %s1368_s30, %s1121_s15 }
  0x4d   : > { %p1118_p6 = pnand %p1116_p0, %p1104_p5  ;;  %p1124_p3 = scmp.lt.s32.totalorder %s1122_s17, %s1115_s16 }
  0x4f   : > { %p1119_p2 = pneg %p1118_p6  ;;  %p1125_p4 = por %p1124_p3, %p1123_p10 }
  0x51   : > { %p1126_p8 = pnand %p1125_p4, %p1119_p2 }
  0x53   : > { %1129 = shalt.err (!%p1126_p8)
}
  0x54   : > { %s1521_s10 = smov 4   ;;  %s1522_s18 = smov 64  }
  0x55   : > { %941 = dma.hbm_to_vmem [thread:$0]  (!%p1364_p11), %s1362_s20, 128, %s1368_s30, %s1370_s8, %s1522_s18, %s1522_s18, %s1521_s10  }
  0x56   : > { %p1523_p6 = scmp.ne.s32.totalorder %s1517_s29, 0 }
  0x57   : > { %s1397_s14 = sand.u32 (!%p1523_p6), 1, %s1194_s22   ;;  %p1524_p4 = scmp.ne.s32.totalorder (!%p1523_p6), %s1515_s27, 0 }
  0x58   : > { %267 = sbr.rel (%p1523_p6) target bundleno = 762 (0x2fa), region = 44  ;;  %s786_s15 = sshll.u32 (!%p1523_p6), %s1397_s14, 3 }
  0x59   : > { %s270_s12 = scalar_lea.sflag (!%p1523_p6), [#allocation3], %s1397_s14  ;;  %s1401_s19 = scalar_lea.vmem (!%p1523_p6), [#allocation2], %s786_s15 }
  0x5d   : > { %1173 = dma.done.wait (%p1524_p4), %s270_s12, 128  }
  0x5e   : > { %1175 = vsyncadd (%p1524_p4), %s270_s12, 4294967168  ;;  %p1525_p8 = scmp.eq.s32.totalorder %s1271_s25, 0 }
  0x60   : > { %1177 = dma.done.wait (%p1525_p8), [#allocation6], 2048   ;;  %p1526_p3 = pmov %p1525_p8 }
  0x62   : > { %1179 = vsyncadd (%p1526_p3), [#allocation6], 4294965248  ;;  %p1527_p11 = pmov %p1526_p3 }
  0x63   : > { %p1528_p5 = pmov %p1526_p3 }
  0x64   : > { %1181 = dma.done.wait (%p1527_p11), [#allocation9], 1024  }
  0x65   : > { %1183 = vsyncadd (%p1528_p5), [#allocation9], 4294966272  ;;  %v1210_v0 = vmov 0.0   ;;  %vm1211_vm0 = vmmov 0   ;;  %v995_v1 = vld [vmem:[#allocation5 + $0x38] sm:$0xff]   ;;  %v996_v2 = vld [vmem:[#allocation5 + $0x30] sm:$0xff]  }
  0x66   : > { %852 = vmatprep.subr.bf16.mxu0 %v1210_v0  ;;  %868 = vmatprep.mubr.msk.bf16.mxu0 %vm1211_vm0, %v1210_v0  ;;  %v997_v3 = vld [vmem:[#allocation5 + $0x28] sm:$0xff]   ;;  %v1004_v4 = vld [vmem:[#allocation7 + $0x38] sm:$0xff]   ;;  %v998_v5 = vld [vmem:[#allocation5 + $0x20] sm:$0xff]   ;;  %s790_s7 = sshll.u32 %s1397_s14, 4  ;;  %s824_s8 = sshll.u32 %s1271_s25, 8 }
  0x67   : > { %872 = vmatprep.subr.bf16.mxu1 %v1210_v0  ;;  %888 = vmatprep.mubr.msk.bf16.mxu1 %vm1211_vm0, %v1210_v0  ;;  %v1005_v6 = vld [vmem:[#allocation7 + $0x30] sm:$0xff]   ;;  %v999_v7 = vld [vmem:[#allocation5 + $0x18] sm:$0xff]   ;;  %v1006_v8 = vld [vmem:[#allocation7 + $0x28] sm:$0xff]   ;;  %s313_s26 = scalar_lea.vmem [#allocation10], %s790_s7  ;;  %s1457_s18 = scalar_lea.hbm %s1508_s6, %s824_s8 }
  0x68   : > { %853 = vmatpush3.bf16.msra.mxu0 %v995_v1  ;;  %873 = vmatpush3.bf16.msra.mxu1 %v1004_v4  ;;  %v1000_v9 = vld [vmem:[#allocation5 + $0x10] sm:$0xff]   ;;  %v1007_v10 = vld [vmem:[#allocation7 + $0x20] sm:$0xff]   ;;  %v1001_v11 = vld [vmem:[#allocation5 + $0x8] sm:$0xff]   ;;  %s674_s16 = sshll.u32 %s313_s26, 4  ;;  %s661_s15 = scalar_lea.sflag [#allocation4], %s1397_s14  ;;  %s1459_s16 = int_to_ptr.vmem [resolvable:$true] %s674_s16 }
  0x69   : > { %854 = vmatprep.subr.bf16.mxu0 %v1210_v0  ;;  %874 = vmatprep.subr.bf16.mxu1 %v1210_v0  ;;  %v1008_v12 = vld [vmem:[#allocation7 + $0x18] sm:$0xff]   ;;  %v1002_v13 = vld [vmem:[#allocation5] sm:$0xff]   ;;  %v1009_v14 = vld [vmem:[#allocation7 + $0x10] sm:$0xff]   ;;  %s1130_s12 = scalar_lea.vmem %s1459_s16, 256  ;;  %p1529_p1 = scmp.ne.s32.totalorder %s1519_s13, 0 }
  0x6a   : > { %v1003_v15 = vld [vmem:[%s1401_s19] sm:$0xff]   ;;  %v1010_v16 = vld [vmem:[#allocation7 + $0x8] sm:$0xff]   ;;  %v1011_v17 = vld [vmem:[#allocation7] sm:$0xff]   ;;  %p1131_p7 = scmp.ne.s32.totalorder %s1459_s16, %s1130_s12  ;;  %s1212_s25 = smov [#allocation10]  }
  0x6b   : > { %v1012_v18 = vld [vmem:[#allocation8 + $0x38] sm:$0xff]   ;;  %v1013_v19 = vld [vmem:[#allocation8 + $0x30] sm:$0xff]   ;;  %v1014_v20 = vld [vmem:[#allocation8 + $0x28] sm:$0xff]   ;;  %s1134_s19 = sshll.u32 %s1212_s25, 4  ;;  %s1135_s19 = int_to_ptr.vmem [resolvable:$false] %s1134_s19 }
  0x6c   : > { %855 = vmatpush3.bf16.msra.mxu0 %v996_v2  ;;  %875 = vmatpush3.bf16.msra.mxu1 %v1005_v6  ;;  %v1015_v21 = vld [vmem:[#allocation8 + $0x20] sm:$0xff]   ;;  %v1016_v22 = vld [vmem:[#allocation8 + $0x18] sm:$0xff]   ;;  %v1017_v23 = vld [vmem:[#allocation8 + $0x10] sm:$0xff]   ;;  %p1132_p12 = pnand %p1131_p7, %p1529_p1  ;;  %s1136_s27 = scalar_lea.vmem %s1135_s19, 512 }
  0x6d   : > { %856 = vmatprep.subr.bf16.mxu0 %v1210_v0  ;;  %876 = vmatprep.subr.bf16.mxu1 %v1210_v0  ;;  %v791_v25 = vld [vmem:[%s1504_s2] ss:$0 sm:$0xff]  ;;  %v1018_v32 = vld [vmem:[#allocation8 + $0x8] sm:$0xff]   ;;  %v1019_v33 = vld [vmem:[#allocation8] sm:$0xff]   ;;  %p1137_p13 = scmp.lt.s32.totalorder %s1459_s16, %s1135_s19  ;;  %p1138_p0 = scmp.lt.s32.totalorder %s1136_s27, %s1130_s12 }
  0x6e   : > { %v801_v35 = vld [vmem:[%s1506_s4] ss:$0 sm:$0xff]  ;;  %p1133_p9 = pneg %p1132_p12 }
  0x6f   : > { %p1139_p2 = por %p1138_p0, %p1137_p13 }
  0x70   : > { %857 = vmatpush3.bf16.msra.mxu0 %v997_v3  ;;  %877 = vmatpush3.bf16.msra.mxu1 %v1006_v8 }
  0x71   : > { %858 = vmatprep.subr.bf16.mxu0 %v1210_v0  ;;  %878 = vmatprep.subr.bf16.mxu1 %v1210_v0  ;;  %p1140_p10 = pnand %p1139_p2, %p1133_p9 }
  0x74   : > { %859 = vmatpush3.bf16.msra.mxu0 %v998_v5  ;;  %879 = vmatpush3.bf16.msra.mxu1 %v1007_v10 }
  0x75   : > { %860 = vmatprep.subr.bf16.mxu0 %v1210_v0  ;;  %880 = vmatprep.subr.bf16.mxu1 %v1210_v0 }
  0x78   : > { %861 = vmatpush3.bf16.msra.mxu0 %v999_v7  ;;  %881 = vmatpush3.bf16.msra.mxu1 %v1008_v12 }
  0x79   : > { %862 = vmatprep.subr.bf16.mxu0 %v1210_v0  ;;  %882 = vmatprep.subr.bf16.mxu1 %v1210_v0 }
  0x7c   : > { %863 = vmatpush3.bf16.msra.mxu0 %v1000_v9  ;;  %883 = vmatpush3.bf16.msra.mxu1 %v1009_v14 }
  0x7d   : > { %864 = vmatprep.subr.bf16.mxu0 %v1210_v0  ;;  %884 = vmatprep.subr.bf16.mxu1 %v1210_v0 }
  0x80   : > { %865 = vmatpush3.bf16.msra.mxu0 %v1001_v11  ;;  %885 = vmatpush3.bf16.msra.mxu1 %v1010_v16 }
  0x81   : > { %866 = vmatprep.subr.bf16.mxu0 %v1210_v0  ;;  %886 = vmatprep.subr.bf16.mxu1 %v1210_v0 }
  0x84   : > { %867 = vmatpush3.bf16.msra.mxu0 %v1002_v13  ;;  %887 = vmatpush3.bf16.msra.mxu1 %v1011_v17 }
  0x85   : > { %892 = vmatprep.subr.bf16.mxu0 %v1210_v0 }
  0x87   : > { %869 = vmatmul.mubr.bf16.vlgmr.msra.gmra.mxu0 %v1003_v15 }
  0x88   : > { %908 = vmatprep.mubr.msk.bf16.mxu0 %vm1211_vm0, %v1210_v0  ;;  %893 = vmatpush3.bf16.msra.mxu0 %v1012_v18 }
  0x89   : > { %894 = vmatprep.subr.bf16.mxu0 %v1210_v0 }
  0x8c   : > { %895 = vmatpush3.bf16.msra.mxu0 %v1013_v19 }
  0x8d   : > { %896 = vmatprep.subr.bf16.mxu0 %v1210_v0 }
  0x90   : > { %897 = vmatpush3.bf16.msra.mxu0 %v1014_v20 }
  0x91   : > { %898 = vmatprep.subr.bf16.mxu0 %v1210_v0 }
  0x94   : > { %899 = vmatpush3.bf16.msra.mxu0 %v1015_v21 }
  0x95   : > { %900 = vmatprep.subr.bf16.mxu0 %v1210_v0 }
  0x98   : > { %901 = vmatpush3.bf16.msra.mxu0 %v1016_v22 }
  0x99   : > { %902 = vmatprep.subr.bf16.mxu0 %v1210_v0 }
  0x9c   : > { %903 = vmatpush3.bf16.msra.mxu0 %v1017_v23 }
  0x9d   : > { %904 = vmatprep.subr.bf16.mxu0 %v1210_v0 }
  0xa0   : > { %905 = vmatpush3.bf16.msra.mxu0 %v1018_v32 }
  0xa1   : > { %906 = vmatprep.subr.bf16.mxu0 %v1210_v0 }
  0xa4   : > { %907 = vmatpush3.bf16.msra.mxu0 %v1019_v33 }
 0x147   : > { %v430_v24 = vpop.f32.mrf.mxu0 }
 0x148   : > { %v431_v28 = vadd.f32 %v791_v25, %v430_v24 }
 0x149   : > { %v870_v26 = vpop.f32.mrf.mxu0 }
 0x14b   : > { %v433_v27 = vpop.f32.mrf.mxu0 }
 0x14c   : > { %v434_v29 = vadd.f32 %v791_v25, %v433_v27 }
 0x14d   : > { %v871_v30 = vpop.f32.mrf.mxu0 }
 0x14e   : > { %v454_v31 = vpack.c.bf16 %v434_v29, %v431_v28 }
 0x150   : > { %889 = vmatmul.mubr.bf16.vlgmr.msra.gmra.mxu1 %v454_v31 }
 0x210   : > { %v543_v34 = vpop.f32.mrf.mxu1 }
 0x211   : > { %v544_v38 = vadd.f32 %v801_v35, %v543_v34 }
 0x212   : > { %v890_v36 = vpop.f32.mrf.mxu1 }
 0x214   : > { %v546_v37 = vpop.f32.mrf.mxu1 }
 0x215   : > { %v547_v39 = vadd.f32 %v801_v35, %v546_v37 }
 0x216   : > { %v891_v40 = vpop.f32.mrf.mxu1 }
 0x217   : > { %v550_v41 = vpack.c.bf16 %v547_v39, %v544_v38 }
 0x219   : > { %909 = vmatmul.mubr.bf16.vlgmr.msra.gmra.mxu0 %v550_v41 }
 0x2d9   : > { %v649_v42 = vpop.f32.mrf.mxu0 }
 0x2da   : > { %1020 = vtanh.f32 %v649_v42 }
 0x2db   : > { %v910_v43 = vpop.f32.mrf.mxu0 }
 0x2dd   : > { %v652_v44 = vpop.f32.mrf.mxu0 }
 0x2de   : > { %1022 = vtanh.f32 %v652_v44 }
 0x2df   : > { %v911_v45 = vpop.f32.mrf.mxu0 }
 0x2e7   : > { %v1021_v46 = vpop.eup %1020 }
 0x2e8   : > { %658 = vst [vmem:[%s313_s26] sm:$0xff] %v1021_v46 }
 0x2eb   : > { %v1023_v47 = vpop.eup %1022 }
 0x2ec   : > { %659 = vst [vmem:[%s313_s26 + $0x8] sm:$0xff] %v1023_v47 }
 0x2ed   : > { %1143 = shalt.err (!%p1140_p10)
}
 0x2ee   : > { %s1144_s29 = scalar_lea.hbm %s1457_s18, 256  ;;  %s1148_s7 = scalar_lea.hbm %s1508_s6, 512 }
 0x2ef   : > { %p1145_p6 = scmp.ne.s32.totalorder %s1457_s18, %s1144_s29  ;;  %p1149_p3 = scmp.lt.s32.totalorder %s1457_s18, %s1508_s6 }
 0x2f0   : > { %p1150_p11 = scmp.lt.s32.totalorder %s1148_s7, %s1144_s29 }
 0x2f1   : > { %p1146_p4 = pnand %p1145_p6, %p1529_p1 }
 0x2f2   : > { %p1151_p5 = por %p1150_p11, %p1149_p3 }
 0x2f3   : > { %p1147_p8 = pneg %p1146_p4 }
 0x2f5   : > { %p1152_p7 = pnand %p1151_p5, %p1147_p8 }
 0x2f7   : > { %1155 = shalt.err (!%p1152_p7)
}
 0x2f8   : > { %s1213_s17 = smov 128   ;;  %s1214_s10 = smov 8  }
 0x2f9   : > { %926 = dma.vmem_to_hbm [thread:$0]  (%p1529_p1), %s1459_s16, 256, %s1457_s18, %s661_s15, %s1213_s17, %s1213_s17, %s1214_s10  }
 0x2fa PF: > { %s689_s12 = sand.u32 1, %s1190_s21   ;;  %p1530_p12 = scmp.ne.s32.totalorder %s1516_s28, 0 }
 0x2fb   : > { %p1531_p9 = scmp.ge.s32.totalorder %s1202_s24, 2  ;;  %s690_s25 = scalar_lea.sflag [#allocation4], %s689_s12 }
 0x2fd   : > { %p943_p13 = pnand %p1531_p9, %p1530_p12 }
 0x2ff   : > { %p944_p0 = pneg %p943_p13 }
 0x301   : > { %1185 = dma.done.wait (%p944_p0), %s690_s25, 256  }
 0x302   : > { %1187 = vsyncadd (%p944_p0), %s690_s25, 4294967040  ;;  %p21_p2 = scmp.ge.s32.totalorder %s1339_s9, 4   ;;  %s1532_s21 = smov %s1194_s22 }
 0x303   : > { %s1533_s22 = smov %s1198_s23  ;;  %s1534_s23 = smov %s1349_s11 }
 0x304   : > { %s1535_s24 = smov %s1339_s9  ;;  %23 = sbr.rel (!%p21_p2) target bundleno = 7 (0x7), region = 101 }
 0x309   :  { %695 = vsyncpa [#allocation3], 1 }
 0x30a   :  { %697 = vsyncpa [#allocation3 + $0x1], 1 }
 0x30b   :  { %698 = vsyncpa [#allocation6], 1 }
 0x30c   :  { %699 = vsyncpa [#allocation9], 1 }
 0x30d   :  { %700 = vsyncpa [#allocation4], 1 }
 0x30e   :  { %702 = vsyncpa [#allocation4 + $0x1], 1 }

// kernel: tpu_custom_call.1
= control target key start
LH: loop header
LB: loop body
LE: loop exit
PB: predicated region body
PF: predicated region fallthrough
CT: control target
= control target key end

     0   :  { %11 = vsyncpa [#allocation3], 0  ;;  %s1502_s0 = inlined_call_operand.hbm [shape: bf16[32,128], index: 0, kind: input, shape index: {}]   ;;  %s1503_s1 = inlined_call_operand.hbm [shape: bf16[128,128], index: 1, kind: input, shape index: {}]   ;;  %s1504_s2 = inlined_call_operand.vmem [shape: f32[1,128], index: 2, kind: input, shape index: {}]   ;;  %s1505_s3 = inlined_call_operand.hbm [shape: bf16[1,128,128], index: 3, kind: input, shape index: {}]   ;;  %s1506_s4 = inlined_call_operand.vmem [shape: f32[1,1,128], index: 4, kind: input, shape index: {}]   ;;  %s1507_s5 = inlined_call_operand.hbm [shape: bf16[128,128], index: 5, kind: input, shape index: {}]   ;;  %s1508_s6 = inlined_call_operand.hbm [shape: f32[32,128], index: 6, kind: output, shape index: {}]  }
   0x1   :  { %13 = vsyncpa [#allocation3 + $0x1], 0 }
   0x2   :  { %14 = vsyncpa [#allocation6], 0 }
   0x3   :  { %15 = vsyncpa [#allocation9], 0 }
   0x4   :  { %16 = vsyncpa [#allocation4], 0 }
   0x5   :  { %18 = vsyncpa [#allocation4 + $0x1], 0  ;;  %s1250_s21 = smov 0   ;;  %s1252_s22 = smov 0  }
   0x6   :  { %s1254_s23 = smov 0   ;;  %s1256_s24 = smov 0  }
   0x7 LB: > { %s1271_s25 = sadd.s32 4294967295, %s1202_s24   ;;  %s776_s26 = sadd.s32 4294967294, %s1202_s24   ;;  %s1202_s24 = sphi %s1256_s24, %s1535_s24   ;;  %s1198_s23 = sphi %s1254_s23, %s1534_s23   ;;  %s1194_s22 = sphi %s1252_s22, %s1533_s22   ;;  %s1190_s21 = sphi %s1250_s21, %s1532_s21  }
   0x8   : > { %p44_p0 = scmp.ne.s32.totalorder %s1194_s22, %s1190_s21  ;;  %p1509_p1 = scmp.eq.s32.totalorder %s1271_s25, 0 }
   0x9   : > { %p173_p2 = scmp.eq.s32.totalorder %s1271_s25, 1  ;;  %p179_p3 = scmp.eq.s32.totalorder %s776_s26, 1 }
   0xa   : > { %p1280_p4 = por %p1509_p1, %p44_p0  ;;  %p777_p5 = scmp.ge.s32.totalorder %s1202_s24, 1 }
   0xb   : > { %p1285_p6 = por %p179_p3, %p44_p0  ;;  %p186_p7 = scmp.lt.s32.totalorder %s1202_s24, 3 }
   0xc   : > { %s1515_s27 = scalar_select %p1280_p4, 1, 0 }
   0xd   : > { %s1516_s28 = scalar_select %p1285_p6, 1, 0 }
   0xe   : > { %p1290_p8 = pnand %p777_p5, %p186_p7  ;;  %s1204_s30 = smov [#allocation5]  }
   0xf   : > { %s198_s7 = sshll.u32 %s1204_s30, 4  ;;  %s1205_s9 = smov [#allocation7]   ;;  %s199_s7 = int_to_ptr.vmem [resolvable:$true] %s198_s7 }
  0x10   : > { %s1517_s29 = scalar_select %p1290_p8, 1, 0 }
  0x11   : > { %p928_p9 = pneg %p1290_p8  ;;  %s214_s10 = sshll.u32 %s1205_s9, 4  ;;  %s215_s10 = int_to_ptr.vmem [resolvable:$true] %s214_s10 }
  0x12   : > { %s1206_s11 = smov [#allocation8]   ;;  %s1035_s13 = scalar_lea.vmem %s199_s7, 1024 }
  0x13   : > { %p1299_p11 = pnand %p928_p9, %p1509_p1  ;;  %s230_s12 = sshll.u32 %s1206_s11, 4  ;;  %s231_s12 = int_to_ptr.vmem [resolvable:$true] %s230_s12 }
  0x14   : > { %p1036_p13 = scmp.ne.s32.totalorder %s199_s7, %s1035_s13  ;;  %p1043_p5 = scmp.lt.s32.totalorder %s199_s7, %s199_s7 }
  0x15   : > { %p1026_p12 = pneg %p1299_p11  ;;  %p1044_p7 = scmp.lt.s32.totalorder %s1035_s13, %s1035_s13 }
  0x17   : > { %p1038_p0 = pnand %p1036_p13, %p1026_p12  ;;  %p1045_p9 = por %p1044_p7, %p1043_p5 }
  0x19   : > { %p1039_p3 = pneg %p1038_p0 }
  0x1b   : > { %p1046_p10 = pnand %p1045_p9, %p1039_p3 }
  0x1d   : > { %1049 = shalt.err (!%p1046_p10)
}
  0x1e   : > { %s1510_s14 = smov 64   ;;  %s1511_s15 = smov 4  }
  0x1f   : > { %931 = dma.hbm_to_vmem [thread:$0]  (!%p1299_p11), %s1503_s1, 1024, %s199_s7, [#allocation6], %s1510_s14, %s1510_s14, %s1511_s15  }
  0x20   : > { %s1061_s18 = scalar_lea.vmem %s215_s10, 1024  ;;  %p1069_p3 = scmp.lt.s32.totalorder %s215_s10, %s215_s10 }
  0x21   : > { %p1062_p13 = scmp.ne.s32.totalorder %s215_s10, %s1061_s18  ;;  %p1070_p10 = scmp.lt.s32.totalorder %s1061_s18, %s1061_s18 }
  0x23   : > { %p1064_p0 = pnand %p1062_p13, %p1026_p12  ;;  %p1071_p7 = por %p1070_p10, %p1069_p3 }
  0x25   : > { %p1065_p5 = pneg %p1064_p0 }
  0x27   : > { %p1072_p9 = pnand %p1071_p7, %p1065_p5 }
  0x29   : > { %1075 = shalt.err (!%p1072_p9)
}
  0x2a   : > { %934 = dma.hbm_to_vmem [thread:$0]  (!%p1299_p11), %s1505_s3, 1024, %s215_s10, [#allocation6], %s1510_s14, %s1510_s14, %s1511_s15  }
  0x2b   : > { %s1087_s26 = scalar_lea.vmem %s231_s12, 1024  ;;  %p1095_p3 = scmp.lt.s32.totalorder %s231_s12, %s231_s12 }
  0x2c   : > { %p1088_p1 = scmp.ne.s32.totalorder %s231_s12, %s1087_s26  ;;  %p1096_p5 = scmp.lt.s32.totalorder %s1087_s26, %s1087_s26 }
  0x2e   : > { %p1090_p13 = pnand %p1088_p1, %p1026_p12  ;;  %p1097_p10 = por %p1096_p5, %p1095_p3 }
  0x30   : > { %p1091_p0 = pneg %p1090_p13 }
  0x32   : > { %p1098_p7 = pnand %p1097_p10, %p1091_p0 }
  0x34   : > { %1101 = shalt.err (!%p1098_p7)
}
  0x35   : > { %937 = dma.hbm_to_vmem [thread:$0]  (!%p1299_p11), %s1507_s5, 1024, %s231_s12, [#allocation9], %s1510_s14, %s1510_s14, %s1511_s15  }
  0x36   : > { %s1339_s9 = sadd.s32 1, %s1202_s24   ;;  %s31_s10 = sadd.s32 1, %s1198_s23 }
  0x37   : > { %s28_s8 = ssub.s32 %s1202_s24, %s1339_s9  ;;  %p38_p12 = scmp.ne.s32.totalorder %s1198_s23, %s1194_s22 }
  0x38   : > { %p29_p1 = scmp.eq.s32.totalorder %s28_s8, 0  ;;  %p39_p9 = scmp.eq.s32.totalorder %s1202_s24, 0 }
  0x39   : > { %p949_p13 = scmp.lt.s32.totalorder %s1202_s24, 2  ;;  %p1353_p3 = por %p173_p2, %p38_p12 }
  0x3a   : > { %s1349_s11 = scalar_select %p29_p1, %s1198_s23, %s31_s10  }
  0x3b   : > { %p40_p0 = por %p39_p9, %p38_p12  ;;  %s244_s16 = sand.u32 1, %s1198_s23  }
  0x3c   : > { %s1519_s13 = scalar_select %p1353_p3, 1, 0 }
  0x3d   : > { %s823_s17 = sshll.u32 %s1202_s24, 7  ;;  %s782_s12 = sshll.u32 %s244_s16, 3 }
  0x3e   : > { %s1362_s20 = scalar_lea.hbm %s1502_s0, %s823_s17  ;;  %s248_s26 = scalar_lea.vmem [#allocation2], %s782_s12 }
  0x3f   : > { %s255_s30 = sshll.u32 %s248_s26, 4  ;;  %p1364_p11 = pnand %p949_p13, %p40_p0  ;;  %s1368_s30 = int_to_ptr.vmem [resolvable:$true] %s255_s30 }
  0x40   : > { %s1370_s8 = scalar_lea.sflag [#allocation3], %s244_s16  ;;  %s1102_s10 = scalar_lea.hbm %s1362_s20, 128 }
  0x41   : > { %p1103_p2 = scmp.ne.s32.totalorder %s1362_s20, %s1102_s10  ;;  %p1104_p5 = pneg %p1364_p11 }
  0x42   : > { %s1107_s12 = scalar_lea.hbm %s1502_s0, 256  ;;  %p1108_p1 = scmp.lt.s32.totalorder %s1362_s20, %s1502_s0 }
  0x43   : > { %p1105_p10 = pnand %p1104_p5, %p1103_p2  ;;  %p1109_p12 = scmp.lt.s32.totalorder %s1107_s12, %s1102_s10 }
  0x45   : > { %p1106_p7 = pneg %p1105_p10  ;;  %p1110_p9 = por %p1109_p12, %p1108_p1 }
  0x47   : > { %p1111_p13 = pnand %p1110_p9, %p1106_p7 }
  0x49   : > { %1114 = shalt.err (!%p1111_p13)
}
  0x4a   : > { %s1115_s16 = scalar_lea.vmem %s1368_s30, 128  ;;  %s1209_s14 = smov [#allocation2]  }
  0x4b   : > { %p1116_p0 = scmp.ne.s32.totalorder %s1368_s30, %s1115_s16  ;;  %s1120_s15 = sshll.u32 %s1209_s14, 4  ;;  %s1121_s15 = int_to_ptr.vmem [resolvable:$false] %s1120_s15 }
  0x4c   : > { %s1122_s17 = scalar_lea.vmem %s1121_s15, 256  ;;  %p1123_p10 = scmp.lt.s32.totalorder %s1368_s30, %s1121_s15 }
  0x4d   : > { %p1118_p6 = pnand %p1116_p0, %p1104_p5  ;;  %p1124_p3 = scmp.lt.s32.totalorder %s1122_s17, %s1115_s16 }
  0x4f   : > { %p1119_p2 = pneg %p1118_p6  ;;  %p1125_p4 = por %p1124_p3, %p1123_p10 }
  0x51   : > { %p1126_p8 = pnand %p1125_p4, %p1119_p2 }
  0x53   : > { %1129 = shalt.err (!%p1126_p8)
}
  0x54   : > { %s1521_s10 = smov 4   ;;  %s1522_s18 = smov 64  }
  0x55   : > { %941 = dma.hbm_to_vmem [thread:$0]  (!%p1364_p11), %s1362_s20, 128, %s1368_s30, %s1370_s8, %s1522_s18, %s1522_s18, %s1521_s10  }
  0x56   : > { %p1523_p6 = scmp.ne.s32.totalorder %s1517_s29, 0 }
  0x57   : > { %s1397_s14 = sand.u32 (!%p1523_p6), 1, %s1194_s22   ;;  %p1524_p4 = scmp.ne.s32.totalorder (!%p1523_p6), %s1515_s27, 0 }
  0x58   : > { %267 = sbr.rel (%p1523_p6) target bundleno = 762 (0x2fa), region = 44  ;;  %s786_s15 = sshll.u32 (!%p1523_p6), %s1397_s14, 3 }
  0x59   : > { %s270_s12 = scalar_lea.sflag (!%p1523_p6), [#allocation3], %s1397_s14  ;;  %s1401_s19 = scalar_lea.vmem (!%p1523_p6), [#allocation2], %s786_s15 }
  0x5d   : > { %1173 = dma.done.wait (%p1524_p4), %s270_s12, 128  }
  0x5e   : > { %1175 = vsyncadd (%p1524_p4), %s270_s12, 4294967168  ;;  %p1525_p8 = scmp.eq.s32.totalorder %s1271_s25, 0 }
  0x60   : > { %1177 = dma.done.wait (%p1525_p8), [#allocation6], 2048   ;;  %p1526_p3 = pmov %p1525_p8 }
  0x62   : > { %1179 = vsyncadd (%p1526_p3), [#allocation6], 4294965248  ;;  %p1527_p11 = pmov %p1526_p3 }
  0x63   : > { %p1528_p5 = pmov %p1526_p3 }
  0x64   : > { %1181 = dma.done.wait (%p1527_p11), [#allocation9], 1024  }
  0x65   : > { %1183 = vsyncadd (%p1528_p5), [#allocation9], 4294966272  ;;  %v1210_v0 = vmov 0.0   ;;  %vm1211_vm0 = vmmov 0   ;;  %v995_v1 = vld [vmem:[#allocation5 + $0x38] sm:$0xff]   ;;  %v996_v2 = vld [vmem:[#allocation5 + $0x30] sm:$0xff]  }
  0x66   : > { %852 = vmatprep.subr.bf16.mxu0 %v1210_v0  ;;  %868 = vmatprep.mubr.msk.bf16.mxu0 %vm1211_vm0, %v1210_v0  ;;  %v997_v3 = vld [vmem:[#allocation5 + $0x28] sm:$0xff]   ;;  %v1004_v4 = vld [vmem:[#allocation7 + $0x38] sm:$0xff]   ;;  %v998_v5 = vld [vmem:[#allocation5 + $0x20] sm:$0xff]   ;;  %s790_s7 = sshll.u32 %s1397_s14, 4  ;;  %s824_s8 = sshll.u32 %s1271_s25, 8 }
  0x67   : > { %872 = vmatprep.subr.bf16.mxu1 %v1210_v0  ;;  %888 = vmatprep.mubr.msk.bf16.mxu1 %vm1211_vm0, %v1210_v0  ;;  %v1005_v6 = vld [vmem:[#allocation7 + $0x30] sm:$0xff]   ;;  %v999_v7 = vld [vmem:[#allocation5 + $0x18] sm:$0xff]   ;;  %v1006_v8 = vld [vmem:[#allocation7 + $0x28] sm:$0xff]   ;;  %s313_s26 = scalar_lea.vmem [#allocation10], %s790_s7  ;;  %s1457_s18 = scalar_lea.hbm %s1508_s6, %s824_s8 }
  0x68   : > { %853 = vmatpush3.bf16.msra.mxu0 %v995_v1  ;;  %873 = vmatpush3.bf16.msra.mxu1 %v1004_v4  ;;  %v1000_v9 = vld [vmem:[#allocation5 + $0x10] sm:$0xff]   ;;  %v1007_v10 = vld [vmem:[#allocation7 + $0x20] sm:$0xff]   ;;  %v1001_v11 = vld [vmem:[#allocation5 + $0x8] sm:$0xff]   ;;  %s674_s16 = sshll.u32 %s313_s26, 4  ;;  %s661_s15 = scalar_lea.sflag [#allocation4], %s1397_s14  ;;  %s1459_s16 = int_to_ptr.vmem [resolvable:$true] %s674_s16 }
  0x69   : > { %854 = vmatprep.subr.bf16.mxu0 %v1210_v0  ;;  %874 = vmatprep.subr.bf16.mxu1 %v1210_v0  ;;  %v1008_v12 = vld [vmem:[#allocation7 + $0x18] sm:$0xff]   ;;  %v1002_v13 = vld [vmem:[#allocation5] sm:$0xff]   ;;  %v1009_v14 = vld [vmem:[#allocation7 + $0x10] sm:$0xff]   ;;  %s1130_s12 = scalar_lea.vmem %s1459_s16, 256  ;;  %p1529_p1 = scmp.ne.s32.totalorder %s1519_s13, 0 }
  0x6a   : > { %v1003_v15 = vld [vmem:[%s1401_s19] sm:$0xff]   ;;  %v1010_v16 = vld [vmem:[#allocation7 + $0x8] sm:$0xff]   ;;  %v1011_v17 = vld [vmem:[#allocation7] sm:$0xff]   ;;  %p1131_p7 = scmp.ne.s32.totalorder %s1459_s16, %s1130_s12  ;;  %s1212_s25 = smov [#allocation10]  }
  0x6b   : > { %v1012_v18 = vld [vmem:[#allocation8 + $0x38] sm:$0xff]   ;;  %v1013_v19 = vld [vmem:[#allocation8 + $0x30] sm:$0xff]   ;;  %v1014_v20 = vld [vmem:[#allocation8 + $0x28] sm:$0xff]   ;;  %s1134_s19 = sshll.u32 %s1212_s25, 4  ;;  %s1135_s19 = int_to_ptr.vmem [resolvable:$false] %s1134_s19 }
  0x6c   : > { %855 = vmatpush3.bf16.msra.mxu0 %v996_v2  ;;  %875 = vmatpush3.bf16.msra.mxu1 %v1005_v6  ;;  %v1015_v21 = vld [vmem:[#allocation8 + $0x20] sm:$0xff]   ;;  %v1016_v22 = vld [vmem:[#allocation8 + $0x18] sm:$0xff]   ;;  %v1017_v23 = vld [vmem:[#allocation8 + $0x10] sm:$0xff]   ;;  %p1132_p12 = pnand %p1131_p7, %p1529_p1  ;;  %s1136_s27 = scalar_lea.vmem %s1135_s19, 512 }
  0x6d   : > { %856 = vmatprep.subr.bf16.mxu0 %v1210_v0  ;;  %876 = vmatprep.subr.bf16.mxu1 %v1210_v0  ;;  %v791_v25 = vld [vmem:[%s1504_s2] ss:$0 sm:$0xff]  ;;  %v1018_v32 = vld [vmem:[#allocation8 + $0x8] sm:$0xff]   ;;  %v1019_v33 = vld [vmem:[#allocation8] sm:$0xff]   ;;  %p1137_p13 = scmp.lt.s32.totalorder %s1459_s16, %s1135_s19  ;;  %p1138_p0 = scmp.lt.s32.totalorder %s1136_s27, %s1130_s12 }
  0x6e   : > { %v801_v35 = vld [vmem:[%s1506_s4] ss:$0 sm:$0xff]  ;;  %p1133_p9 = pneg %p1132_p12 }
  0x6f   : > { %p1139_p2 = por %p1138_p0, %p1137_p13 }
  0x70   : > { %857 = vmatpush3.bf16.msra.mxu0 %v997_v3  ;;  %877 = vmatpush3.bf16.msra.mxu1 %v1006_v8 }
  0x71   : > { %858 = vmatprep.subr.bf16.mxu0 %v1210_v0  ;;  %878 = vmatprep.subr.bf16.mxu1 %v1210_v0  ;;  %p1140_p10 = pnand %p1139_p2, %p1133_p9 }
  0x74   : > { %859 = vmatpush3.bf16.msra.mxu0 %v998_v5  ;;  %879 = vmatpush3.bf16.msra.mxu1 %v1007_v10 }
  0x75   : > { %860 = vmatprep.subr.bf16.mxu0 %v1210_v0  ;;  %880 = vmatprep.subr.bf16.mxu1 %v1210_v0 }
  0x78   : > { %861 = vmatpush3.bf16.msra.mxu0 %v999_v7  ;;  %881 = vmatpush3.bf16.msra.mxu1 %v1008_v12 }
  0x79   : > { %862 = vmatprep.subr.bf16.mxu0 %v1210_v0  ;;  %882 = vmatprep.subr.bf16.mxu1 %v1210_v0 }
  0x7c   : > { %863 = vmatpush3.bf16.msra.mxu0 %v1000_v9  ;;  %883 = vmatpush3.bf16.msra.mxu1 %v1009_v14 }
  0x7d   : > { %864 = vmatprep.subr.bf16.mxu0 %v1210_v0  ;;  %884 = vmatprep.subr.bf16.mxu1 %v1210_v0 }
  0x80   : > { %865 = vmatpush3.bf16.msra.mxu0 %v1001_v11  ;;  %885 = vmatpush3.bf16.msra.mxu1 %v1010_v16 }
  0x81   : > { %866 = vmatprep.subr.bf16.mxu0 %v1210_v0  ;;  %886 = vmatprep.subr.bf16.mxu1 %v1210_v0 }
  0x84   : > { %867 = vmatpush3.bf16.msra.mxu0 %v1002_v13  ;;  %887 = vmatpush3.bf16.msra.mxu1 %v1011_v17 }
  0x85   : > { %892 = vmatprep.subr.bf16.mxu0 %v1210_v0 }
  0x87   : > { %869 = vmatmul.mubr.bf16.vlgmr.msra.gmra.mxu0 %v1003_v15 }
  0x88   : > { %908 = vmatprep.mubr.msk.bf16.mxu0 %vm1211_vm0, %v1210_v0  ;;  %893 = vmatpush3.bf16.msra.mxu0 %v1012_v18 }
  0x89   : > { %894 = vmatprep.subr.bf16.mxu0 %v1210_v0 }
  0x8c   : > { %895 = vmatpush3.bf16.msra.mxu0 %v1013_v19 }
  0x8d   : > { %896 = vmatprep.subr.bf16.mxu0 %v1210_v0 }
  0x90   : > { %897 = vmatpush3.bf16.msra.mxu0 %v1014_v20 }
  0x91   : > { %898 = vmatprep.subr.bf16.mxu0 %v1210_v0 }
  0x94   : > { %899 = vmatpush3.bf16.msra.mxu0 %v1015_v21 }
  0x95   : > { %900 = vmatprep.subr.bf16.mxu0 %v1210_v0 }
  0x98   : > { %901 = vmatpush3.bf16.msra.mxu0 %v1016_v22 }
  0x99   : > { %902 = vmatprep.subr.bf16.mxu0 %v1210_v0 }
  0x9c   : > { %903 = vmatpush3.bf16.msra.mxu0 %v1017_v23 }
  0x9d   : > { %904 = vmatprep.subr.bf16.mxu0 %v1210_v0 }
  0xa0   : > { %905 = vmatpush3.bf16.msra.mxu0 %v1018_v32 }
  0xa1   : > { %906 = vmatprep.subr.bf16.mxu0 %v1210_v0 }
  0xa4   : > { %907 = vmatpush3.bf16.msra.mxu0 %v1019_v33 }
 0x147   : > { %v430_v24 = vpop.f32.mrf.mxu0 }
 0x148   : > { %v431_v28 = vadd.f32 %v791_v25, %v430_v24 }
 0x149   : > { %v870_v26 = vpop.f32.mrf.mxu0 }
 0x14b   : > { %v433_v27 = vpop.f32.mrf.mxu0 }
 0x14c   : > { %v434_v29 = vadd.f32 %v791_v25, %v433_v27 }
 0x14d   : > { %v871_v30 = vpop.f32.mrf.mxu0 }
 0x14e   : > { %v454_v31 = vpack.c.bf16 %v434_v29, %v431_v28 }
 0x150   : > { %889 = vmatmul.mubr.bf16.vlgmr.msra.gmra.mxu1 %v454_v31 }
 0x210   : > { %v543_v34 = vpop.f32.mrf.mxu1 }
 0x211   : > { %v544_v38 = vadd.f32 %v801_v35, %v543_v34 }
 0x212   : > { %v890_v36 = vpop.f32.mrf.mxu1 }
 0x214   : > { %v546_v37 = vpop.f32.mrf.mxu1 }
 0x215   : > { %v547_v39 = vadd.f32 %v801_v35, %v546_v37 }
 0x216   : > { %v891_v40 = vpop.f32.mrf.mxu1 }
 0x217   : > { %v550_v41 = vpack.c.bf16 %v547_v39, %v544_v38 }
 0x219   : > { %909 = vmatmul.mubr.bf16.vlgmr.msra.gmra.mxu0 %v550_v41 }
 0x2d9   : > { %v649_v42 = vpop.f32.mrf.mxu0 }
 0x2da   : > { %1020 = vtanh.f32 %v649_v42 }
 0x2db   : > { %v910_v43 = vpop.f32.mrf.mxu0 }
 0x2dd   : > { %v652_v44 = vpop.f32.mrf.mxu0 }
 0x2de   : > { %1022 = vtanh.f32 %v652_v44 }
 0x2df   : > { %v911_v45 = vpop.f32.mrf.mxu0 }
 0x2e7   : > { %v1021_v46 = vpop.eup %1020 }
 0x2e8   : > { %658 = vst [vmem:[%s313_s26] sm:$0xff] %v1021_v46 }
 0x2eb   : > { %v1023_v47 = vpop.eup %1022 }
 0x2ec   : > { %659 = vst [vmem:[%s313_s26 + $0x8] sm:$0xff] %v1023_v47 }
 0x2ed   : > { %1143 = shalt.err (!%p1140_p10)
}
 0x2ee   : > { %s1144_s29 = scalar_lea.hbm %s1457_s18, 256  ;;  %s1148_s7 = scalar_lea.hbm %s1508_s6, 512 }
 0x2ef   : > { %p1145_p6 = scmp.ne.s32.totalorder %s1457_s18, %s1144_s29  ;;  %p1149_p3 = scmp.lt.s32.totalorder %s1457_s18, %s1508_s6 }
 0x2f0   : > { %p1150_p11 = scmp.lt.s32.totalorder %s1148_s7, %s1144_s29 }
 0x2f1   : > { %p1146_p4 = pnand %p1145_p6, %p1529_p1 }
 0x2f2   : > { %p1151_p5 = por %p1150_p11, %p1149_p3 }
 0x2f3   : > { %p1147_p8 = pneg %p1146_p4 }
 0x2f5   : > { %p1152_p7 = pnand %p1151_p5, %p1147_p8 }
 0x2f7   : > { %1155 = shalt.err (!%p1152_p7)
}
 0x2f8   : > { %s1213_s17 = smov 128   ;;  %s1214_s10 = smov 8  }
 0x2f9   : > { %926 = dma.vmem_to_hbm [thread:$0]  (%p1529_p1), %s1459_s16, 256, %s1457_s18, %s661_s15, %s1213_s17, %s1213_s17, %s1214_s10  }
 0x2fa PF: > { %s689_s12 = sand.u32 1, %s1190_s21   ;;  %p1530_p12 = scmp.ne.s32.totalorder %s1516_s28, 0 }
 0x2fb   : > { %p1531_p9 = scmp.ge.s32.totalorder %s1202_s24, 2  ;;  %s690_s25 = scalar_lea.sflag [#allocation4], %s689_s12 }
 0x2fd   : > { %p943_p13 = pnand %p1531_p9, %p1530_p12 }
 0x2ff   : > { %p944_p0 = pneg %p943_p13 }
 0x301   : > { %1185 = dma.done.wait (%p944_p0), %s690_s25, 256  }
 0x302   : > { %1187 = vsyncadd (%p944_p0), %s690_s25, 4294967040  ;;  %p21_p2 = scmp.ge.s32.totalorder %s1339_s9, 4   ;;  %s1532_s21 = smov %s1194_s22 }
 0x303   : > { %s1533_s22 = smov %s1198_s23  ;;  %s1534_s23 = smov %s1349_s11 }
 0x304   : > { %s1535_s24 = smov %s1339_s9  ;;  %23 = sbr.rel (!%p21_p2) target bundleno = 7 (0x7), region = 101 }
 0x309   :  { %695 = vsyncpa [#allocation3], 1 }
 0x30a   :  { %697 = vsyncpa [#allocation3 + $0x1], 1 }
 0x30b   :  { %698 = vsyncpa [#allocation6], 1 }
 0x30c   :  { %699 = vsyncpa [#allocation9], 1 }
 0x30d   :  { %700 = vsyncpa [#allocation4], 1 }
 0x30e   :  { %702 = vsyncpa [#allocation4 + $0x1], 1 }

</bundles_post_ra>
